<compile_context>
chip_gen: v6e
topology: v6e:2x2x1
jax: 0.10.0
libtpu: 0.0.40
codegen_flags: <defaults>
</compile_context>

<pallas_src>
import functools

import jax
import jax.numpy as jnp
from jax.experimental import pallas as pl
from jax.experimental.pallas import tpu as pltpu


C_IN = 3       # RGB
C_STEM = 32    # stem channels (B7 uses 64; scaled down)
C_EXP = 128    # MBConv expansion channels
FEAT = 128     # feature dim (B7 produces 2560; scaled down)


# ------------------------------ fused kernel ------------------------------- #

def _silu(x):
    # sigmoid(x) = 1 / (1 + exp(-x)); exp -> EUP, approx reciprocal -> EUP,
    # keeping the divide off the VALU slot.  f32 in/out (v5e has no bf16 EUP).
    return x * pl.reciprocal(1.0 + jnp.exp(-x), approx=True)


def _fused_backbone_kernel(p_ref, ws_ref, bs_ref, we_ref, be_ref,
                           wh_ref, wph_ref, bf_ref, out_ref, acc_ref, *, s_total):
    """stem GEMM+SiLU -> 1x1 expand+SiLU -> fused(project+residual+head)+SiLU -> GAP.

    grid = (B, num_row_tiles); p_ref holds one (1, tm, 9*C_IN) bf16 patch tile,
    all weights are VMEM-resident (constant block index), acc_ref accumulates
    the per-batch column sum of the head output for the global average pool.
    """
    t = pl.program_id(1)
    tm = p_ref.shape[1]
    last_t = pl.num_programs(1) - 1

    @pl.when(t == 0)
    def _():
        acc_ref[...] = jnp.zeros_like(acc_ref)

    x = p_ref[0]  # (tm, 9*C_IN) bf16 raw-pixel patches (normalization folded into ws/bs)

    # stem 3x3/stride-2 conv (as GEMM) + SiLU -- f32 accumulation on the MXU output
    h = jnp.dot(x, ws_ref[...], preferred_element_type=jnp.float32) + bs_ref[...]
    h = _silu(h)

    # MBConv-lite 1x1 expand + SiLU (in VMEM, never HBM)
    e = jnp.dot(h.astype(jnp.bfloat16), we_ref[...],
                preferred_element_type=jnp.float32) + be_ref[...]
    e = _silu(e)

    # fused project + residual + head:
    #   f = (h + (e @ Wp + bp)) @ Wh + bh  ==  h @ Wh + e @ (Wp @ Wh) + (bp @ Wh + bh)
    # -> no 32-lane `pr`/residual intermediates, lane-dense FEAT=128 output.
    f = (jnp.dot(h.astype(jnp.bfloat16), wh_ref[...], preferred_element_type=jnp.float32)
         + jnp.dot(e.astype(jnp.bfloat16), wph_ref[...], preferred_element_type=jnp.float32)
         + bf_ref[...])
    f = _silu(f)

    # global-average-pool accumulation; the ragged-tile row mask (select, NOT a
    # multiply -- padded rows may hold garbage/NaN bf16 patterns) only runs on the
    # final tile.
    @pl.when(t != last_t)
    def _():
        acc_ref[...] += jnp.sum(f, axis=0, keepdims=True)

    @pl.when(t == last_t)
    def _():
        row = t * tm + jax.lax.broadcasted_iota(jnp.int32, (tm, 1), 0)
        acc_ref[...] += jnp.sum(jnp.where(row < s_total, f, 0.0),
                                axis=0, keepdims=True)
        out_ref[...] = (acc_ref[...] * (1.0 / s_total))[None].astype(out_ref.dtype)


# --------------------------------- glue ------------------------------------ #

def im2col(x_nhwc, kh, kw, stride, pad):
    """Extract conv patches (plain-JAX data rearrangement; GEMM stays in Pallas).

    Runs in bf16 (caller casts first) to halve the XLA-side slab traffic.
    TODO(synk): for real 600x600 inputs, stream overlapping padded NHWC row bands
    (1-row halo) directly via BlockSpec / manual DMA and build the 9 shifted
    (tm,3C)x(3C,C_STEM) accumulations in-kernel instead of materializing the 9x
    im2col slab in HBM.
    """
    x = jnp.pad(x_nhwc, ((0, 0), (pad, pad), (pad, pad), (0, 0)))
    B, H, W, C = x.shape
    oh = (H - kh) // stride + 1
    ow = (W - kw) // stride + 1
    patches = []
    for i in range(kh):
        for j in range(kw):
            patches.append(x[:, i:i + oh * stride:stride, j:j + ow * stride:stride, :])
    p = jnp.concatenate(patches, axis=-1)  # (B, oh, ow, kh*kw*C)
    return p, oh, ow


def init_params(key):
    ks = jax.random.split(key, 4)

    def w_init(k, shape):
        fan_in = shape[0]
        return jax.random.normal(k, shape, jnp.float32) * jnp.sqrt(2.0 / fan_in)

    return {
        # EfficientNet preprocessing constants (ImageNet mean / std)
        "mean": jnp.array([[0.485, 0.456, 0.406]], jnp.float32),
        "inv_std": 1.0 / jnp.array([[0.229, 0.224, 0.225]], jnp.float32),
        # stem 3x3 conv (BN folded into bias)
        "w_stem": w_init(ks[0], (3 * 3 * C_IN, C_STEM)),
        "b_stem": jnp.zeros((1, C_STEM), jnp.float32),
        # MBConv-lite: 1x1 expand / 1x1 project
        "w_exp": w_init(ks[1], (C_STEM, C_EXP)),
        "b_exp": jnp.zeros((1, C_EXP), jnp.float32),
        "w_proj": w_init(ks[2], (C_EXP, C_STEM)),
        "b_proj": jnp.zeros((1, C_STEM), jnp.float32),
        # 1x1 head conv producing the feature map that feeds global pooling
        "w_head": w_init(ks[3], (C_STEM, FEAT)),
        "b_head": jnp.zeros((1, FEAT), jnp.float32),
    }


def cnn_forward(x_nchw, params, tm=4096):
    """Forward pass mirroring CNN.forward: preprocess -> backbone -> pooled features."""
    B, C, H, W = x_nchw.shape
    # NCHW -> NHWC, cast to bf16 BEFORE im2col so pad/slice/concat emit bf16 directly.
    x = jnp.transpose(x_nchw, (0, 2, 3, 1)).astype(jnp.bfloat16)

    # Fold the per-channel (x - mean) * inv_std normalization into the stem
    # conv weights/bias (eliminates a full memory pass over the image).
    # TODO(synk): bicubic resize(600)/center-crop(600) from
    # EfficientNet_B7_Weights.DEFAULT.transforms() has no clean Pallas
    # equivalent; inputs are assumed already at target size and in [0, 1].
    inv_std = params["inv_std"][0]                     # (3,)
    mean = params["mean"][0]                           # (3,)
    scale = jnp.tile(inv_std, 9)                       # (27,)  im2col order: pos-major, channel-minor
    shift = jnp.tile(mean * inv_std, 9)                # (27,)
    w_stem_eff = params["w_stem"] * scale[:, None]     # (27, C_STEM)
    b_stem_eff = params["b_stem"] - shift[None, :] @ params["w_stem"]  # (1, C_STEM)

    # Fold project + head: f = h@Wh + e@(Wp@Wh) + (bp@Wh + bh)   (f32 fold, then bf16)
    w_ph = params["w_proj"] @ params["w_head"]                          # (C_EXP, FEAT)
    b_f = params["b_proj"] @ params["w_head"] + params["b_head"]        # (1, FEAT)

    # im2col for the stem 3x3 stride-2 conv; patches are bf16 throughout.
    patches, oh, ow = im2col(x, 3, 3, stride=2, pad=1)
    S = oh * ow
    Kp = patches.shape[-1]
    patches = patches.reshape(B, S, Kp)

    tm = min(tm, S)                 # 4096-row tiles at real sizes; full extent on toy input
    T = pl.cdiv(S, tm)

    # bf16 GEMM operands (MXU-native); biases stay f32.
    w_stem_bf = w_stem_eff.astype(jnp.bfloat16)
    w_exp_bf = params["w_exp"].astype(jnp.bfloat16)
    w_head_bf = params["w_head"].astype(jnp.bfloat16)
    w_ph_bf = w_ph.astype(jnp.bfloat16)

    const = lambda shape: pl.BlockSpec(shape, lambda b, t: (0, 0))  # VMEM-resident weights

    kernel = functools.partial(_fused_backbone_kernel, s_total=S)
    feats = pl.pallas_call(
        kernel,
        out_shape=jax.ShapeDtypeStruct((B, 1, FEAT), jnp.float32),
        grid=(B, T),
        in_specs=[
            pl.BlockSpec((1, tm, Kp), lambda b, t: (b, t, 0)),   # streamed patch tile
            const(w_stem_bf.shape), const(b_stem_eff.shape),
            const(w_exp_bf.shape), const(params["b_exp"].shape),
            const(w_head_bf.shape), const(w_ph_bf.shape), const(b_f.shape),
        ],
        # per-batch output block -> safe to shard the batch axis across cores (v7x)
        out_specs=pl.BlockSpec((1, 1, FEAT), lambda b, t: (b, 0, 0)),
        scratch_shapes=[pltpu.VMEM((1, FEAT), jnp.float32)],     # per-batch GAP accumulator
        compiler_params=pltpu.CompilerParams(
            dimension_semantics=("parallel", "arbitrary")),
    )(patches, w_stem_bf, b_stem_eff, w_exp_bf, params["b_exp"],
      w_head_bf, w_ph_bf, b_f)

    # classifier was replaced by nn.Sequential() -> output is the pooled feature vector
    return feats.reshape(B, FEAT)


if __name__ == "__main__":
    key = jax.random.PRNGKey(0)
    xkey, pkey = jax.random.split(key)
    # small synthetic image batch in [0, 1], NCHW like PyTorch
    x = jax.random.uniform(xkey, (2, 3, 16, 16), dtype=jnp.float32)
    params = init_params(pkey)

    out = cnn_forward(x, params)
    out = jax.block_until_ready(out)
    assert out.shape == (2, FEAT) and out.dtype == jnp.float32
    assert bool(jnp.all(jnp.isfinite(out)))
    print("KERNEL_OK")
</pallas_src>

<mosaic_0001>
module attributes {stable_mosaic.version = 11 : i64} {
  func.func @_fused_backbone_kernel(%arg0: i32, %arg1: i32, %arg2: memref<1x64x27xbf16, #tpu.memory_space<vmem>>, %arg3: memref<27x32xbf16, #tpu.memory_space<vmem>>, %arg4: memref<1x32xf32, #tpu.memory_space<vmem>>, %arg5: memref<32x128xbf16, #tpu.memory_space<vmem>>, %arg6: memref<1x128xf32, #tpu.memory_space<vmem>>, %arg7: memref<32x128xbf16, #tpu.memory_space<vmem>>, %arg8: memref<128x128xbf16, #tpu.memory_space<vmem>>, %arg9: memref<1x128xf32, #tpu.memory_space<vmem>>, %arg10: memref<1x1x128xf32, #tpu.memory_space<vmem>>, %arg11: memref<1x128xf32, #tpu.memory_space<vmem>>) attributes {dimension_semantics = [#tpu.dimension_semantics<parallel>, #tpu.dimension_semantics<arbitrary>], iteration_bounds = array<i64: 2, 1>, scalar_prefetch = 0 : i64, scratch_operands = 1 : i64, tpu.core_type = #tpu.core_type<tc>, window_params = [{transform_indices = @transform_0, window_bounds = array<i64: 1, 64, 27>}, {pipeline_mode = #tpu.pipeline_mode<synchronous>, transform_indices = @transform_1, window_bounds = array<i64: 27, 32>}, {pipeline_mode = #tpu.pipeline_mode<synchronous>, transform_indices = @transform_2, window_bounds = array<i64: 1, 32>}, {pipeline_mode = #tpu.pipeline_mode<synchronous>, transform_indices = @transform_3, window_bounds = array<i64: 32, 128>}, {pipeline_mode = #tpu.pipeline_mode<synchronous>, transform_indices = @transform_4, window_bounds = array<i64: 1, 128>}, {pipeline_mode = #tpu.pipeline_mode<synchronous>, transform_indices = @transform_5, window_bounds = array<i64: 32, 128>}, {pipeline_mode = #tpu.pipeline_mode<synchronous>, transform_indices = @transform_6, window_bounds = array<i64: 128, 128>}, {pipeline_mode = #tpu.pipeline_mode<synchronous>, transform_indices = @transform_7, window_bounds = array<i64: 1, 128>}, {transform_indices = @transform_8, window_bounds = array<i64: 1, 1, 128>}]} {
    %c0_i32 = arith.constant 0 : i32
    %0 = arith.cmpi eq, %arg1, %c0_i32 : i32
    %1 = arith.extui %0 : i1 to i32
    %c0_i32_0 = arith.constant 0 : i32
    %2 = arith.cmpi ne, %1, %c0_i32_0 : i32
    scf.if %2 {
      %cst_30 = arith.constant 0.000000e+00 : f32
      %53 = vector.broadcast %cst_30 : f32 to vector<1x128xf32>
      %c0_31 = arith.constant 0 : index
      %c0_32 = arith.constant 0 : index
      %54 = vector.load %arg11[%c0_31, %c0_32] : memref<1x128xf32, #tpu.memory_space<vmem>>, vector<1x128xf32>
      tpu.vector_store %arg11[%c0_31, %c0_32], %53 {strides = array<i32>} : memref<1x128xf32, #tpu.memory_space<vmem>>, vector<1x128xf32>,
    } else {
    }
    %c0 = arith.constant 0 : index
    %c0_1 = arith.constant 0 : index
    %c0_2 = arith.constant 0 : index
    %3 = vector.load %arg2[%c0, %c0_1, %c0_2] : memref<1x64x27xbf16, #tpu.memory_space<vmem>>, vector<1x64x27xbf16>
    %4 = vector.shape_cast %3 : vector<1x64x27xbf16> to vector<64x27xbf16>
    %c0_3 = arith.constant 0 : index
    %c0_4 = arith.constant 0 : index
    %5 = vector.load %arg3[%c0_3, %c0_4] : memref<27x32xbf16, #tpu.memory_space<vmem>>, vector<27x32xbf16>
    %cst = arith.constant dense<0.000000e+00> : vector<64x32xf32>
    %6 = tpu.matmul %4, %5, %cst {dimension_numbers = #tpu.dot_dimension_numbers<[1], [0], [0], [1], [0, 0, 1, 1], [], []>} : vector<64x27xbf16>, vector<27x32xbf16>, vector<64x32xf32> -> vector<64x32xf32>
    %c0_5 = arith.constant 0 : index
    %c0_6 = arith.constant 0 : index
    %7 = vector.load %arg4[%c0_5, %c0_6] : memref<1x32xf32, #tpu.memory_space<vmem>>, vector<1x32xf32>
    %8 = vector.broadcast %7 : vector<1x32xf32> to vector<64x32xf32>
    %9 = arith.addf %6, %8 : vector<64x32xf32>
    %cst_7 = arith.constant 0.000000e+00 : f32
    %10 = vector.broadcast %cst_7 : f32 to vector<64x32xf32>
    %11 = arith.subf %10, %9 : vector<64x32xf32>
    %12 = math.exp %11 : vector<64x32xf32>
    %cst_8 = arith.constant 1.000000e+00 : f32
    %13 = vector.broadcast %cst_8 : f32 to vector<64x32xf32>
    %14 = arith.addf %13, %12 : vector<64x32xf32>
    %15 = tpu.reciprocal %14 {approx = true} : vector<64x32xf32> -> vector<64x32xf32>
    %16 = arith.mulf %9, %15 : vector<64x32xf32>
    %17 = arith.truncf %16 : vector<64x32xf32> to vector<64x32xbf16>
    %c0_9 = arith.constant 0 : index
    %c0_10 = arith.constant 0 : index
    %18 = vector.load %arg5[%c0_9, %c0_10] : memref<32x128xbf16, #tpu.memory_space<vmem>>, vector<32x128xbf16>
    %cst_11 = arith.constant dense<0.000000e+00> : vector<64x128xf32>
    %19 = tpu.matmul %17, %18, %cst_11 {dimension_numbers = #tpu.dot_dimension_numbers<[1], [0], [0], [1], [0, 0, 1, 1], [], []>} : vector<64x32xbf16>, vector<32x128xbf16>, vector<64x128xf32> -> vector<64x128xf32>
    %c0_12 = arith.constant 0 : index
    %c0_13 = arith.constant 0 : index
    %20 = vector.load %arg6[%c0_12, %c0_13] : memref<1x128xf32, #tpu.memory_space<vmem>>, vector<1x128xf32>
    %21 = vector.broadcast %20 : vector<1x128xf32> to vector<64x128xf32>
    %22 = arith.addf %19, %21 : vector<64x128xf32>
    %cst_14 = arith.constant 0.000000e+00 : f32
    %23 = vector.broadcast %cst_14 : f32 to vector<64x128xf32>
    %24 = arith.subf %23, %22 : vector<64x128xf32>
    %25 = math.exp %24 : vector<64x128xf32>
    %cst_15 = arith.constant 1.000000e+00 : f32
    %26 = vector.broadcast %cst_15 : f32 to vector<64x128xf32>
    %27 = arith.addf %26, %25 : vector<64x128xf32>
    %28 = tpu.reciprocal %27 {approx = true} : vector<64x128xf32> -> vector<64x128xf32>
    %29 = arith.mulf %22, %28 : vector<64x128xf32>
    %30 = arith.truncf %16 : vector<64x32xf32> to vector<64x32xbf16>
    %c0_16 = arith.constant 0 : index
    %c0_17 = arith.constant 0 : index
    %31 = vector.load %arg7[%c0_16, %c0_17] : memref<32x128xbf16, #tpu.memory_space<vmem>>, vector<32x128xbf16>
    %cst_18 = arith.constant dense<0.000000e+00> : vector<64x128xf32>
    %32 = tpu.matmul %30, %31, %cst_18 {dimension_numbers = #tpu.dot_dimension_numbers<[1], [0], [0], [1], [0, 0, 1, 1], [], []>} : vector<64x32xbf16>, vector<32x128xbf16>, vector<64x128xf32> -> vector<64x128xf32>
    %33 = arith.truncf %29 : vector<64x128xf32> to vector<64x128xbf16>
    %c0_19 = arith.constant 0 : index
    %c0_20 = arith.constant 0 : index
    %34 = vector.load %arg8[%c0_19, %c0_20] : memref<128x128xbf16, #tpu.memory_space<vmem>>, vector<128x128xbf16>
    %cst_21 = arith.constant dense<0.000000e+00> : vector<64x128xf32>
    %35 = tpu.matmul %33, %34, %cst_21 {dimension_numbers = #tpu.dot_dimension_numbers<[1], [0], [0], [1], [0, 0, 1, 1], [], []>} : vector<64x128xbf16>, vector<128x128xbf16>, vector<64x128xf32> -> vector<64x128xf32>
    %36 = arith.addf %32, %35 : vector<64x128xf32>
    %c0_22 = arith.constant 0 : index
    %c0_23 = arith.constant 0 : index
    %37 = vector.load %arg9[%c0_22, %c0_23] : memref<1x128xf32, #tpu.memory_space<vmem>>, vector<1x128xf32>
    %38 = vector.broadcast %37 : vector<1x128xf32> to vector<64x128xf32>
    %39 = arith.addf %36, %38 : vector<64x128xf32>
    %cst_24 = arith.constant 0.000000e+00 : f32
    %40 = vector.broadcast %cst_24 : f32 to vector<64x128xf32>
    %41 = arith.subf %40, %39 : vector<64x128xf32>
    %42 = math.exp %41 : vector<64x128xf32>
    %cst_25 = arith.constant 1.000000e+00 : f32
    %43 = vector.broadcast %cst_25 : f32 to vector<64x128xf32>
    %44 = arith.addf %43, %42 : vector<64x128xf32>
    %45 = tpu.reciprocal %44 {approx = true} : vector<64x128xf32> -> vector<64x128xf32>
    %46 = arith.mulf %39, %45 : vector<64x128xf32>
    %c0_i32_26 = arith.constant 0 : i32
    %47 = arith.cmpi ne, %arg1, %c0_i32_26 : i32
    %48 = arith.extui %47 : i1 to i32
    %c0_i32_27 = arith.constant 0 : i32
    %49 = arith.cmpi ne, %48, %c0_i32_27 : i32
    scf.if %49 {
      %c0_30 = arith.constant 0 : index
      %c0_31 = arith.constant 0 : index
      %53 = vector.load %arg11[%c0_30, %c0_31] : memref<1x128xf32, #tpu.memory_space<vmem>>, vector<1x128xf32>
      %cst_32 = arith.constant dense<0.000000e+00> : vector<128xf32>
      %54 = vector.multi_reduction <add>, %46, %cst_32 [0] : vector<64x128xf32> to vector<128xf32>
      %55 = vector.shape_cast %54 : vector<128xf32> to vector<1x128xf32>
      %56 = arith.addf %53, %55 : vector<1x128xf32>
      %c0_33 = arith.constant 0 : index
      %c0_34 = arith.constant 0 : index
      %57 = vector.load %arg11[%c0_33, %c0_34] : memref<1x128xf32, #tpu.memory_space<vmem>>, vector<1x128xf32>
      tpu.vector_store %arg11[%c0_33, %c0_34], %56 {strides = array<i32>} : memref<1x128xf32, #tpu.memory_space<vmem>>, vector<1x128xf32>,
    } else {
    }
    %c0_i32_28 = arith.constant 0 : i32
    %50 = arith.cmpi eq, %arg1, %c0_i32_28 : i32
    %51 = arith.extui %50 : i1 to i32
    %c0_i32_29 = arith.constant 0 : i32
    %52 = arith.cmpi ne, %51, %c0_i32_29 : i32
    scf.if %52 {
      %c64_i32 = arith.constant 64 : i32
      %53 = arith.muli %arg1, %c64_i32 : i32
      %54 = tpu.iota {dimensions = array<i32: 0>} : vector<64x1xi32>
      %55 = vector.broadcast %53 : i32 to vector<64x1xi32>
      %56 = arith.addi %55, %54 : vector<64x1xi32>
      %c0_30 = arith.constant 0 : index
      %c0_31 = arith.constant 0 : index
      %57 = vector.load %arg11[%c0_30, %c0_31] : memref<1x128xf32, #tpu.memory_space<vmem>>, vector<1x128xf32>
      %c64_i32_32 = arith.constant 64 : i32
      %58 = vector.broadcast %c64_i32_32 : i32 to vector<64x1xi32>
      %59 = arith.cmpi slt, %56, %58 : vector<64x1xi32>
      %cst_33 = arith.constant 0.000000e+00 : f32
      %60 = vector.shape_cast %59 : vector<64x1xi1> to vector<64x1xi1>
      %61 = vector.broadcast %60 : vector<64x1xi1> to vector<64x128xi1>
      %62 = vector.broadcast %cst_33 : f32 to vector<64x128xf32>
      %63 = arith.select %61, %46, %62 : vector<64x128xi1>, vector<64x128xf32>
      %cst_34 = arith.constant dense<0.000000e+00> : vector<128xf32>
      %64 = vector.multi_reduction <add>, %63, %cst_34 [0] : vector<64x128xf32> to vector<128xf32>
      %65 = vector.shape_cast %64 : vector<128xf32> to vector<1x128xf32>
      %66 = arith.addf %57, %65 : vector<1x128xf32>
      %c0_35 = arith.constant 0 : index
      %c0_36 = arith.constant 0 : index
      %67 = vector.load %arg11[%c0_35, %c0_36] : memref<1x128xf32, #tpu.memory_space<vmem>>, vector<1x128xf32>
      tpu.vector_store %arg11[%c0_35, %c0_36], %66 {strides = array<i32>} : memref<1x128xf32, #tpu.memory_space<vmem>>, vector<1x128xf32>,
      %c0_37 = arith.constant 0 : index
      %c0_38 = arith.constant 0 : index
      %68 = vector.load %arg11[%c0_37, %c0_38] : memref<1x128xf32, #tpu.memory_space<vmem>>, vector<1x128xf32>
      %cst_39 = arith.constant 1.562500e-02 : f32
      %69 = vector.broadcast %cst_39 : f32 to vector<1x128xf32>
      %70 = arith.mulf %68, %69 : vector<1x128xf32>
      %71 = vector.shape_cast %70 : vector<1x128xf32> to vector<1x1x128xf32>
      %c0_40 = arith.constant 0 : index
      %c0_41 = arith.constant 0 : index
      %c0_42 = arith.constant 0 : index
      %72 = vector.load %arg10[%c0_40, %c0_41, %c0_42] : memref<1x1x128xf32, #tpu.memory_space<vmem>>, vector<1x1x128xf32>
      tpu.vector_store %arg10[%c0_40, %c0_41, %c0_42], %71 {strides = array<i32>} : memref<1x1x128xf32, #tpu.memory_space<vmem>>, vector<1x1x128xf32>,
    } else {
    }
    return
  }
  func.func @transform_0(%arg0: i32, %arg1: i32) -> (i32, i32, i32) {
    %c0_i32 = arith.constant 0 : i32
    %c0_i32_0 = arith.constant 0 : i32
    return %arg0, %arg1, %c0_i32 : i32, i32, i32
  }
  func.func @transform_1(%arg0: i32, %arg1: i32) -> (i32, i32) {
    %c0_i32 = arith.constant 0 : i32
    %c0_i32_0 = arith.constant 0 : i32
    %c0_i32_1 = arith.constant 0 : i32
    return %c0_i32, %c0_i32_0 : i32, i32
  }
  func.func @transform_2(%arg0: i32, %arg1: i32) -> (i32, i32) {
    %c0_i32 = arith.constant 0 : i32
    %c0_i32_0 = arith.constant 0 : i32
    %c0_i32_1 = arith.constant 0 : i32
    return %c0_i32, %c0_i32_0 : i32, i32
  }
  func.func @transform_3(%arg0: i32, %arg1: i32) -> (i32, i32) {
    %c0_i32 = arith.constant 0 : i32
    %c0_i32_0 = arith.constant 0 : i32
    %c0_i32_1 = arith.constant 0 : i32
    return %c0_i32, %c0_i32_0 : i32, i32
  }
  func.func @transform_4(%arg0: i32, %arg1: i32) -> (i32, i32) {
    %c0_i32 = arith.constant 0 : i32
    %c0_i32_0 = arith.constant 0 : i32
    %c0_i32_1 = arith.constant 0 : i32
    return %c0_i32, %c0_i32_0 : i32, i32
  }
  func.func @transform_5(%arg0: i32, %arg1: i32) -> (i32, i32) {
    %c0_i32 = arith.constant 0 : i32
    %c0_i32_0 = arith.constant 0 : i32
    %c0_i32_1 = arith.constant 0 : i32
    return %c0_i32, %c0_i32_0 : i32, i32
  }
  func.func @transform_6(%arg0: i32, %arg1: i32) -> (i32, i32) {
    %c0_i32 = arith.constant 0 : i32
    %c0_i32_0 = arith.constant 0 : i32
    %c0_i32_1 = arith.constant 0 : i32
    return %c0_i32, %c0_i32_0 : i32, i32
  }
  func.func @transform_7(%arg0: i32, %arg1: i32) -> (i32, i32) {
    %c0_i32 = arith.constant 0 : i32
    %c0_i32_0 = arith.constant 0 : i32
    %c0_i32_1 = arith.constant 0 : i32
    return %c0_i32, %c0_i32_0 : i32, i32
  }
  func.func @transform_8(%arg0: i32, %arg1: i32) -> (i32, i32, i32) {
    %c0_i32 = arith.constant 0 : i32
    %c0_i32_0 = arith.constant 0 : i32
    %c0_i32_1 = arith.constant 0 : i32
    return %arg0, %c0_i32, %c0_i32_0 : i32, i32, i32
  }
}

</mosaic_0001>

<bundles_post_ra>
// kernel: tpu_custom_call.1
= control target key start
LH: loop header
LB: loop body
LE: loop exit
PB: predicated region body
PF: predicated region fallthrough
CT: control target
= control target key end

     0   :  { %13 = vsyncpa [#allocation4], 0  ;;  %s1848_s0 = inlined_call_operand.vmem [shape: bf16[2,64,27], index: 0, kind: input, shape index: {}]   ;;  %s1849_s1 = inlined_call_operand.vmem [shape: bf16[27,32], index: 1, kind: input, shape index: {}]   ;;  %s1850_s2 = inlined_call_operand.vmem [shape: f32[1,32], index: 2, kind: input, shape index: {}]   ;;  %s1851_s3 = inlined_call_operand.vmem [shape: bf16[32,128], index: 3, kind: input, shape index: {}]   ;;  %s1852_s4 = inlined_call_operand.vmem [shape: f32[1,128], index: 4, kind: input, shape index: {}]   ;;  %s1853_s5 = inlined_call_operand.hbm [shape: bf16[32,128], index: 5, kind: input, shape index: {}]   ;;  %s1854_s6 = inlined_call_operand.vmem [shape: bf16[128,128], index: 6, kind: input, shape index: {}]   ;;  %s1855_s7 = inlined_call_operand.vmem [shape: f32[1,128], index: 7, kind: input, shape index: {}]   ;;  %s1856_s8 = inlined_call_operand.hbm [shape: f32[2,1,128], index: 8, kind: output, shape index: {}]  }
   0x1   :  { %14 = vsyncpa [#allocation5], 0 }
   0x2   :  { %16 = vsyncpa [#allocation5 + $0x1], 0  ;;  %s1631_s27 = smov 0   ;;  %s1633_s28 = smov 0  }
   0x3   :  { %s1635_s29 = smov 0   ;;  %s1637_s30 = smov 0  }
   0x4   :  { %s1639_s9 = smov 0   ;;  %s1641_s10 = smov 0  }
   0x5 LB: > { %s1152_s11 = sadd.s32 4294967295, %s1578_s10   ;;  %s1153_s12 = sadd.s32 4294967294, %s1578_s10   ;;  %s1578_s10 = sphi %s1641_s10, %s22_s10   ;;  %s1574_s9 = sphi %s1639_s9, %s1865_s9   ;;  %s1570_s30 = sphi %s1637_s30, %s1864_s30   ;;  %s1566_s29 = sphi %s1635_s29, %s1863_s29   ;;  %s1562_s28 = sphi %s1633_s28, %s1862_s28   ;;  %s1558_s27 = sphi %s1631_s27, %s1861_s27  }
   0x6   : > { %s34_s13 = sadd.s32 1, %s1574_s9  ;;  %s216_s14 = sadd.s32 1, %s1566_s29 }
   0x7   : > { %p36_p0 = scmp.ge.s32.totalorder %s34_s13, 2  ;;  %p226_p1 = scmp.ne.s32.totalorder %s1566_s29, %s1562_s28 }
   0x8   : > { %p227_p2 = scmp.eq.s32.totalorder %s1152_s11, 1  ;;  %p232_p3 = scmp.ne.s32.totalorder %s1562_s28, %s1558_s27 }
   0x9   : > { %s1867_s13 = smov (%p36_p0, %s34_s13), 0  ;;  %p233_p5 = scmp.eq.s32.totalorder %s1153_s12, 1 }
   0xa   : > { %p1671_p4 = por %p227_p2, %p226_p1  ;;  %s213_s16 = ssub.s32 %s1574_s9, %s1867_s13 }
   0xb   : > { %p1154_p6 = scmp.ge.s32.totalorder %s1578_s10, 1  ;;  %p214_p7 = scmp.eq.s32.totalorder %s213_s16, 0 }
   0xc   : > { %p1678_p8 = por %p233_p5, %p232_p3  ;;  %p240_p9 = scmp.lt.s32.totalorder %s1578_s10, 3 }
   0xd   : > { %s1684_s18 = scalar_select %p214_p7, %s1566_s29, %s216_s14  }
   0xe   : > { %p1686_p10 = pnand %p1154_p6, %p240_p9  ;;  %p1690_p11 = scmp.eq.s32.totalorder %s1152_s11, 0 }
   0xf   : > { %s1580_s21 = smov [#allocation3]  }
  0x10   : > { %p1294_p12 = pneg %p1686_p10  ;;  %s264_s22 = sshll.u32 %s1580_s21, 4  ;;  %s265_s22 = int_to_ptr.vmem [resolvable:$true] %s264_s22 }
  0x11   : > { %s1483_s23 = scalar_lea.vmem %s265_s22, 256  ;;  %p1491_p5 = scmp.lt.s32.totalorder %s265_s22, %s265_s22 }
  0x12   : > { %p1295_p13 = pnand %p1690_p11, %p1294_p12  ;;  %p1484_p1 = scmp.ne.s32.totalorder %s265_s22, %s1483_s23 }
  0x13   : > { %p1492_p6 = scmp.lt.s32.totalorder %s1483_s23, %s1483_s23 }
  0x14   : > { %p1474_p0 = pneg %p1295_p13 }
  0x15   : > { %p1493_p7 = por %p1492_p6, %p1491_p5 }
  0x16   : > { %p1486_p2 = pnand %p1484_p1, %p1474_p0 }
  0x18   : > { %p1487_p3 = pneg %p1486_p2 }
  0x1a   : > { %p1494_p9 = pnand %p1493_p7, %p1487_p3 }
  0x1c   : > { %1497 = shalt.err (!%p1494_p9)
}
  0x1d   : > { %s1581_s24 = smov 64   ;;  %s1582_s25 = smov 4  }
  0x1e   : > { %1297 = dma.hbm_to_vmem [thread:$0]  (!%p1295_p13), %s1853_s5, 256, %s265_s22, [#allocation4], %s1581_s24, %s1581_s24, %s1582_s25  }
  0x1f   : > { %299 = sbr.rel (%p1686_p10) target bundleno = 820 (0x334), region = 52 }
  0x24   : > { %1549 = dma.done.wait (%p1690_p11), [#allocation4], 256  }
  0x25   : > { %1551 = vsyncadd (%p1690_p11), [#allocation4], 4294967040  ;;  %vm415_vm0 = vcmask 1044480   ;;  %p337_p12 = scmp.lt.s32.totalorder %s1570_s30, 1  ;;  %vm416_vm1 = vcmask 1045504   ;;  %v1583_v0 = vmov 65535  }
  0x26   : > { %v417_v1 = vsel %vm415_vm0, 4294967295, %v1583_v0  ;;  %v1358_v3 = vld [vmem:[%s1849_s1 + $0x8] sm:$0x3f]   ;;  %v1359_v4 = vld [vmem:[%s1849_s1] sm:$0xff]   ;;  %vm402_vm2 = vcmask 220160   ;;  %vm562_vm3 = vcmask 261120  }
  0x27   : > { %s338_s12 = scalar_select %p337_p12, %s1570_s30, 1  ;;  %v418_v2 = vsel %vm416_vm1, %v417_v1, 0  ;;  %v1364_v10 = vld [vmem:[%s1851_s3 + $0x8] sm:$0xff]   ;;  %v1365_v11 = vld [vmem:[%s1851_s3] sm:$0xff]  }
  0x28   : > { %v420_v5 = vand.u32 %v1358_v3, %v418_v2  ;;  %1240 = vmatprep.subr.bf16.mxu1 %v1364_v10  ;;  %v1724_v12 = vld [vmem:[#allocation3 + $0x8] sm:$0xff]   ;;  %v1161_v13 = vld [vmem:[%s1850_s2] ss:$0 sm:$0xff]  ;;  %s334_s11 = sand.u32 1, %s1562_s28   ;;  %s1585_s24 = smov [#allocation6]  }
  0x29   : > { %s1197_s14 = sshll.u32 %s338_s12, 5  ;;  %1241 = vmatpush3.bf16.msra.mxu1 %v1364_v10  ;;  %s1194_s12 = sshll.u32 %s1570_s30, 4 }
  0x2a   : > { %s344_s19 = scalar_lea.vmem %s1848_s0, %s1197_s14  ;;  %1228 = vmatprep.subr.bf16.mxu0 %v420_v5  ;;  %1242 = vmatprep.subr.bf16.mxu1 %v1365_v11  ;;  %s335_s14 = scalar_lea.vmem [#allocation6], %s334_s11 }
  0x2b   : > { %v1360_v6 = vld [vmem:[%s344_s19] sm:$0xff]   ;;  %1229 = vmatpush3.bf16.msra.mxu0 %v420_v5  ;;  %v1361_v7 = vld [vmem:[%s344_s19 + $0x8] sm:$0xff]   ;;  %v1362_v8 = vld [vmem:[%s344_s19 + $0x10] sm:$0xff]   ;;  %s1071_s16 = sshll.u32 %s335_s14, 4  ;;  %s1069_s22 = scalar_lea.hbm %s1856_s8, %s1194_s12  ;;  %s1072_s16 = int_to_ptr.vmem [resolvable:$true] %s1071_s16 }
  0x2c   : > { %1232 = vmatprep.mubr.msk.bf16.mxu0 %vm402_vm2, %v1360_v6  ;;  %1230 = vmatprep.subr.bf16.mxu0 %v1359_v4  ;;  %v1363_v9 = vld [vmem:[%s344_s19 + $0x18] sm:$0xff]   ;;  %s1059_s23 = scalar_lea.sflag [#allocation5], %s334_s11  ;;  %s1498_s20 = scalar_lea.vmem %s1072_s16, 16 }
  0x2d   : > { %1243 = vmatpush3.bf16.msra.mxu1 %v1365_v11  ;;  %p1499_p10 = scmp.ne.s32.totalorder %s1072_s16, %s1498_s20  ;;  %s1502_s25 = sshll.u32 %s1585_s24, 4  ;;  %s1503_s25 = int_to_ptr.vmem [resolvable:$false] %s1502_s25 }
  0x2e   : > { %1276 = vmatprep.subr.bf16.mxu1 %v1724_v12  ;;  %s1504_s30 = scalar_lea.vmem %s1503_s25, 32  ;;  %p1505_p0 = scmp.lt.s32.totalorder %s1072_s16, %s1503_s25 }
  0x2f   : > { %1231 = vmatpush3.bf16.msra.mxu0 %v1359_v4  ;;  %p1500_p11 = pnand %p1499_p10, %p1671_p4  ;;  %p1506_p1 = scmp.lt.s32.totalorder %s1504_s30, %s1498_s20 }
  0x31   : > { %p1501_p13 = pneg %p1500_p11  ;;  %p1507_p2 = por %p1506_p1, %p1505_p0 }
  0x32   : > { %1233 = vmatmul.mubr.msk.bf16.vlgmr.msra.gmra.mxu0 %vm402_vm2, %v1361_v7 }
  0x33   : > { %1236 = vmatprep.mubr.msk.bf16.mxu0 %vm402_vm2, %v1362_v8  ;;  %v1367_v8 = vld [vmem:[#allocation3] sm:$0xff]   ;;  %p1508_p3 = pnand %p1507_p2, %p1501_p13 }
  0x3a   : > { %1237 = vmatmul.mubr.msk.bf16.gmra.mxu0 %vm402_vm2, %v1363_v9 }
  0xf2   : > { %v1234_v14 = vpop.f32.mrf.mxu0 }
  0xf3   : > { %v1730_v15 = vadd.f32 %v1234_v14, %v1161_v13 }
  0xf4   : > { %v456_v16 = vpop.f32.mrf.mxu0 }
  0xf5   : > { %v489_v17 = vsub.f32 0.0, %v1730_v15  ;;  %v1733_v18 = vadd.f32 %v1161_v13, %v456_v16 }
  0xf6   : > { %v1235_v19 = vpop.f32.mrf.mxu0 }
  0xf7   : > { %v499_v20 = vmul.f32 1.442695, %v489_v17  ;;  %v487_v21 = vsub.f32 0.0, %v1733_v18  ;;  %v468_v22 = vadd.f32 %v1235_v19, %v1161_v13 }
  0xf8   : > { %v459_v23 = vpop.f32.mrf.mxu0 }
  0xf9   : > { %v495_v24 = vmul.f32 1.442695, %v487_v21  ;;  %v490_v25 = vsub.f32 0.0, %v468_v22  ;;  %v460_v26 = vadd.f32 %v1161_v13, %v459_v23  ;;  %1376 = vpow2.f32 %v499_v20  ;;  %v1369_v20 = vld [vmem:[%s1854_s6 + $0x30] sm:$0xff]   ;;  %v1370_v21 = vld [vmem:[%s1854_s6 + $0x28] sm:$0xff]   ;;  %v1372_v23 = vld [vmem:[%s1854_s6 + $0x18] sm:$0xff]  }
  0xfa   : > { %v1238_v27 = vpop.f32.mrf.mxu0 }
  0xfb   : > { %1378 = vpow2.f32 %v495_v24  ;;  %v501_v28 = vmul.f32 1.442695, %v490_v25  ;;  %v488_v29 = vsub.f32 0.0, %v460_v26  ;;  %v1736_v30 = vadd.f32 %v1238_v27, %v1161_v13  ;;  %v1373_v24 = vld [vmem:[%s1854_s6 + $0x10] sm:$0xff]   ;;  %v1374_v25 = vld [vmem:[%s1854_s6 + $0x8] sm:$0xff]  }
  0xfc   : > { %v472_v31 = vpop.f32.mrf.mxu0  ;;  %v1172_v27 = vld [vmem:[%s1852_s4] ss:$0 sm:$0xff] }
  0xfd   : > { %1380 = vpow2.f32 %v501_v28  ;;  %v497_v32 = vmul.f32 1.442695, %v488_v29  ;;  %v493_v33 = vsub.f32 0.0, %v1736_v30  ;;  %v473_v34 = vadd.f32 %v1161_v13, %v472_v31 }
  0xfe   : > { %v1239_v35 = vpop.f32.mrf.mxu0 }
  0xff   : > { %1382 = vpow2.f32 %v497_v32  ;;  %v507_v36 = vmul.f32 1.442695, %v493_v33  ;;  %v491_v37 = vsub.f32 0.0, %v473_v34  ;;  %v484_v38 = vadd.f32 %v1239_v35, %v1161_v13 }
 0x100   : > { %v475_v39 = vpop.f32.mrf.mxu0 }
 0x101   : > { %v503_v40 = vmul.f32 1.442695, %v491_v37  ;;  %v494_v41 = vsub.f32 0.0, %v484_v38  ;;  %v476_v42 = vadd.f32 %v1161_v13, %v475_v39  ;;  %1384 = vpow2.f32 %v507_v36 }
 0x103   : > { %1386 = vpow2.f32 %v503_v40  ;;  %v509_v43 = vmul.f32 1.442695, %v494_v41  ;;  %v492_v44 = vsub.f32 0.0, %v476_v42 }
 0x105   : > { %1388 = vpow2.f32 %v509_v43  ;;  %v505_v45 = vmul.f32 1.442695, %v492_v44 }
 0x106   : > { %v1377_v46 = vpop.eup %1376 }
 0x107   : > { %1390 = vpow2.f32 %v505_v45  ;;  %v513_v50 = vadd.f32 1.0, %v1377_v46 }
 0x108   : > { %v1379_v47 = vpop.eup %1378 }
 0x109   : > { %v511_v48 = vadd.f32 1.0, %v1379_v47 }
 0x10a   : > { %v1381_v49 = vpop.eup %1380 }
 0x10b   : > { %v514_v51 = vadd.f32 1.0, %v1381_v49  ;;  %1392 = vrcp.f32 %v511_v48 }
 0x10c   : > { %v1383_v52 = vpop.eup %1382 }
 0x10d   : > { %1394 = vrcp.f32 %v514_v51  ;;  %v512_v53 = vadd.f32 1.0, %v1383_v52 }
 0x10e   : > { %1396 = vrcp.f32 %v513_v50  ;;  %v1385_v54 = vpop.eup %1384 }
 0x10f   : > { %1398 = vrcp.f32 %v512_v53  ;;  %v517_v58 = vadd.f32 1.0, %v1385_v54 }
 0x110   : > { %v1387_v55 = vpop.eup %1386 }
 0x111   : > { %v515_v56 = vadd.f32 1.0, %v1387_v55 }
 0x112   : > { %v1389_v57 = vpop.eup %1388 }
 0x113   : > { %v518_v59 = vadd.f32 1.0, %v1389_v57  ;;  %1400 = vrcp.f32 %v515_v56 }
 0x114   : > { %v1391_v60 = vpop.eup %1390 }
 0x115   : > { %1402 = vrcp.f32 %v518_v59  ;;  %v516_v61 = vadd.f32 1.0, %v1391_v60 }
 0x116   : > { %1404 = vrcp.f32 %v517_v58 }
 0x117   : > { %1406 = vrcp.f32 %v516_v61 }
 0x118   : > { %v1393_v62 = vpop.eup %1392 }
 0x119   : > { %v527_v3 = vmul.f32 %v1393_v62, %v1733_v18 }
 0x11a   : > { %v1395_v63 = vpop.eup %1394 }
 0x11b   : > { %v1397_v0 = vpop.eup %1396  ;;  %v530_v2 = vmul.f32 %v1395_v63, %v468_v22  ;;  %v1371_v22 = vld [vmem:[%s1854_s6 + $0x20] sm:$0xff]  }
 0x11c   : > { %v1399_v1 = vpop.eup %1398  ;;  %v529_v5 = vmul.f32 %v1397_v0, %v1730_v15 }
 0x11d   : > { %v528_v4 = vmul.f32 %v1399_v1, %v460_v26  ;;  %v1375_v26 = vld [vmem:[%s1854_s6] sm:$0xff]  }
 0x11e   : > { %v536_v7 = vpack.c.bf16 %v530_v2, %v529_v5 }
 0x11f   : > { %v535_v6 = vpack.c.bf16 %v528_v4, %v527_v3 }
 0x120   : > { %v1401_v9 = vpop.eup %1400 }
 0x121   : > { %1244 = vmatprep.mubr.msk.bf16.mxu1 %vm562_vm3, %v535_v6  ;;  %v531_v16 = vmul.f32 %v1401_v9, %v473_v34 }
 0x122   : > { %v1403_v10 = vpop.eup %1402  ;;  %1245 = vmatmul.mubr.msk.bf16.vlgmr.msra.gmra.mxu1 %vm562_vm3, %v536_v7 }
 0x123   : > { %v1405_v11 = vpop.eup %1404  ;;  %1277 = vmatpush3.bf16.msra.mxu1 %v1724_v12  ;;  %v534_v14 = vmul.f32 %v1403_v10, %v484_v38  ;;  %v1368_v12 = vld [vmem:[%s1854_s6 + $0x38] sm:$0xff]  }
 0x124   : > { %v1407_v13 = vpop.eup %1406  ;;  %1278 = vmatprep.subr.bf16.mxu1 %v1367_v8  ;;  %v533_v15 = vmul.f32 %v1405_v11, %v1736_v30  ;;  %1252 = vmatprep.subr.bf16.mxu0 %v1368_v12 }
 0x125   : > { %v532_v17 = vmul.f32 %v1407_v13, %v476_v42  ;;  %1253 = vmatpush3.bf16.msra.mxu0 %v1368_v12 }
 0x126   : > { %v538_v19 = vpack.c.bf16 %v534_v14, %v533_v15  ;;  %1254 = vmatprep.subr.bf16.mxu0 %v1369_v20 }
 0x127   : > { %v537_v18 = vpack.c.bf16 %v532_v17, %v531_v16  ;;  %1279 = vmatpush3.bf16.msra.mxu1 %v1367_v8 }
 0x129   : > { %1248 = vmatprep.mubr.msk.bf16.mxu1 %vm562_vm3, %v537_v18  ;;  %1255 = vmatpush3.bf16.msra.mxu0 %v1369_v20 }
 0x12a   : > { %1249 = vmatmul.mubr.msk.bf16.gmra.mxu1 %vm562_vm3, %v538_v19  ;;  %1256 = vmatprep.subr.bf16.mxu0 %v1370_v21 }
 0x12b   : > { %1280 = vmatprep.mubr.msk.bf16.mxu1 %vm562_vm3, %v535_v6 }
 0x12d   : > { %1257 = vmatpush3.bf16.msra.mxu0 %v1370_v21 }
 0x12e   : > { %1258 = vmatprep.subr.bf16.mxu0 %v1371_v22 }
 0x131   : > { %1259 = vmatpush3.bf16.msra.mxu0 %v1371_v22 }
 0x132   : > { %1281 = vmatmul.mubr.msk.bf16.vlgmr.msra.gmra.mxu1 %vm562_vm3, %v536_v7  ;;  %1260 = vmatprep.subr.bf16.mxu0 %v1372_v23 }
 0x133   : > { %1284 = vmatprep.mubr.msk.bf16.mxu1 %vm562_vm3, %v537_v18 }
 0x135   : > { %1261 = vmatpush3.bf16.msra.mxu0 %v1372_v23 }
 0x136   : > { %1262 = vmatprep.subr.bf16.mxu0 %v1373_v24 }
 0x139   : > { %1263 = vmatpush3.bf16.msra.mxu0 %v1373_v24 }
 0x13a   : > { %1285 = vmatmul.mubr.msk.bf16.gmra.mxu1 %vm562_vm3, %v538_v19  ;;  %1264 = vmatprep.subr.bf16.mxu0 %v1374_v25 }
 0x13d   : > { %1265 = vmatpush3.bf16.msra.mxu0 %v1374_v25 }
 0x13e   : > { %1266 = vmatprep.subr.bf16.mxu0 %v1375_v26 }
 0x141   : > { %1267 = vmatpush3.bf16.msra.mxu0 %v1375_v26 }
 0x1e2   : > { %v1246_v28 = vpop.f32.mrf.mxu1 }
 0x1e3   : > { %v1778_v29 = vadd.f32 %v1246_v28, %v1172_v27 }
 0x1e4   : > { %v609_v30 = vpop.f32.mrf.mxu1 }
 0x1e5   : > { %v642_v31 = vsub.f32 0.0, %v1778_v29  ;;  %v1781_v32 = vadd.f32 %v1172_v27, %v609_v30 }
 0x1e6   : > { %v1247_v33 = vpop.f32.mrf.mxu1 }
 0x1e7   : > { %v652_v34 = vmul.f32 1.442695, %v642_v31  ;;  %v640_v35 = vsub.f32 0.0, %v1781_v32  ;;  %v621_v36 = vadd.f32 %v1247_v33, %v1172_v27 }
 0x1e8   : > { %v612_v37 = vpop.f32.mrf.mxu1 }
 0x1e9   : > { %v648_v38 = vmul.f32 1.442695, %v640_v35  ;;  %v643_v39 = vsub.f32 0.0, %v621_v36  ;;  %v613_v40 = vadd.f32 %v1172_v27, %v612_v37  ;;  %1408 = vpow2.f32 %v652_v34 }
 0x1ea   : > { %v1250_v41 = vpop.f32.mrf.mxu1 }
 0x1eb   : > { %1410 = vpow2.f32 %v648_v38  ;;  %v654_v42 = vmul.f32 1.442695, %v643_v39  ;;  %v641_v43 = vsub.f32 0.0, %v613_v40  ;;  %v1784_v44 = vadd.f32 %v1250_v41, %v1172_v27  ;;  %v1193_v38 = vld [vmem:[%s1855_s7] ss:$0 sm:$0xff] }
 0x1ec   : > { %v625_v45 = vpop.f32.mrf.mxu1 }
 0x1ed   : > { %1412 = vpow2.f32 %v654_v42  ;;  %v650_v46 = vmul.f32 1.442695, %v641_v43  ;;  %v646_v47 = vsub.f32 0.0, %v1784_v44  ;;  %v626_v48 = vadd.f32 %v1172_v27, %v625_v45 }
 0x1ee   : > { %v1251_v49 = vpop.f32.mrf.mxu1 }
 0x1ef   : > { %1414 = vpow2.f32 %v650_v46  ;;  %v660_v50 = vmul.f32 1.442695, %v646_v47  ;;  %v644_v51 = vsub.f32 0.0, %v626_v48  ;;  %v637_v52 = vadd.f32 %v1251_v49, %v1172_v27 }
 0x1f0   : > { %v628_v53 = vpop.f32.mrf.mxu1 }
 0x1f1   : > { %v656_v54 = vmul.f32 1.442695, %v644_v51  ;;  %v647_v55 = vsub.f32 0.0, %v637_v52  ;;  %v629_v56 = vadd.f32 %v1172_v27, %v628_v53  ;;  %1416 = vpow2.f32 %v660_v50 }
 0x1f3   : > { %1418 = vpow2.f32 %v656_v54  ;;  %v662_v57 = vmul.f32 1.442695, %v647_v55  ;;  %v645_v58 = vsub.f32 0.0, %v629_v56 }
 0x1f5   : > { %1420 = vpow2.f32 %v662_v57  ;;  %v658_v59 = vmul.f32 1.442695, %v645_v58 }
 0x1f6   : > { %v1409_v60 = vpop.eup %1408 }
 0x1f7   : > { %1422 = vpow2.f32 %v658_v59  ;;  %v666_v0 = vadd.f32 1.0, %v1409_v60 }
 0x1f8   : > { %v1411_v61 = vpop.eup %1410 }
 0x1f9   : > { %v664_v62 = vadd.f32 1.0, %v1411_v61 }
 0x1fa   : > { %v1413_v63 = vpop.eup %1412 }
 0x1fb   : > { %v667_v1 = vadd.f32 1.0, %v1413_v63  ;;  %1424 = vrcp.f32 %v664_v62 }
 0x1fc   : > { %v1415_v2 = vpop.eup %1414 }
 0x1fd   : > { %1426 = vrcp.f32 %v667_v1  ;;  %v665_v3 = vadd.f32 1.0, %v1415_v2 }
 0x1fe   : > { %1428 = vrcp.f32 %v666_v0  ;;  %v1417_v4 = vpop.eup %1416 }
 0x1ff   : > { %1430 = vrcp.f32 %v665_v3  ;;  %v670_v8 = vadd.f32 1.0, %v1417_v4 }
 0x200   : > { %v1419_v5 = vpop.eup %1418 }
 0x201   : > { %v668_v6 = vadd.f32 1.0, %v1419_v5 }
 0x202   : > { %v1421_v7 = vpop.eup %1420 }
 0x203   : > { %v671_v9 = vadd.f32 1.0, %v1421_v7  ;;  %1432 = vrcp.f32 %v668_v6 }
 0x204   : > { %v1423_v10 = vpop.eup %1422 }
 0x205   : > { %1434 = vrcp.f32 %v671_v9  ;;  %v669_v11 = vadd.f32 1.0, %v1423_v10 }
 0x206   : > { %1436 = vrcp.f32 %v670_v8 }
 0x207   : > { %1438 = vrcp.f32 %v669_v11 }
 0x208   : > { %v1425_v13 = vpop.eup %1424 }
 0x209   : > { %v680_v18 = vmul.f32 %v1425_v13, %v1781_v32  ;;  %v1584_v32 = vmov 0.0  }
 0x20a   : > { %v1427_v14 = vpop.eup %1426  ;;  %351 = vst [vmem:[#allocation2] sm:$0x1] %v1584_v32 }
 0x20b   : > { %v1429_v16 = vpop.eup %1428  ;;  %v683_v15 = vmul.f32 %v1427_v14, %v621_v36 }
 0x20c   : > { %v1431_v17 = vpop.eup %1430  ;;  %v682_v12 = vmul.f32 %v1429_v16, %v1778_v29  ;;  %v1282_v29 = vpop.f32.mrf.mxu1 }
 0x20d   : > { %v681_v19 = vmul.f32 %v1431_v17, %v613_v40 }
 0x20e   : > { %v693_v21 = vpack.c.bf16 %v683_v15, %v682_v12  ;;  %v871_v34 = vpop.f32.mrf.mxu1 }
 0x20f   : > { %v692_v20 = vpack.c.bf16 %v681_v19, %v680_v18 }
 0x210   : > { %v1433_v22 = vpop.eup %1432  ;;  %v1283_v35 = vpop.f32.mrf.mxu1 }
 0x211   : > { %1268 = vmatprep.mubr.bf16.mxu0 %v692_v20  ;;  %v684_v27 = vmul.f32 %v1433_v22, %v626_v48 }
 0x212   : > { %v1435_v23 = vpop.eup %1434  ;;  %1269 = vmatmul.mubr.bf16.vlgmr.msra.gmra.mxu0 %v693_v21  ;;  %v874_v36 = vpop.f32.mrf.mxu1 }
 0x213   : > { %v1437_v24 = vpop.eup %1436  ;;  %v687_v26 = vmul.f32 %v1435_v23, %v637_v52 }
 0x214   : > { %v1439_v25 = vpop.eup %1438  ;;  %v686_v30 = vmul.f32 %v1437_v24, %v1784_v44  ;;  %v1286_v40 = vpop.f32.mrf.mxu1 }
 0x215   : > { %v685_v28 = vmul.f32 %v1439_v25, %v629_v56 }
 0x216   : > { %v695_v33 = vpack.c.bf16 %v687_v26, %v686_v30  ;;  %v887_v48 = vpop.f32.mrf.mxu1 }
 0x217   : > { %v694_v31 = vpack.c.bf16 %v685_v28, %v684_v27 }
 0x218   : > { %v1287_v58 = vpop.f32.mrf.mxu1 }
 0x219   : > { %1272 = vmatprep.mubr.bf16.mxu0 %v694_v31 }
 0x21a   : > { %1273 = vmatmul.mubr.bf16.gmra.mxu0 %v695_v33  ;;  %v890_v5 = vpop.f32.mrf.mxu1 }
 0x2d2   : > { %v1270_v37 = vpop.f32.mrf.mxu0 }
 0x2d3   : > { %v880_v39 = vadd.f32 %v1282_v29, %v1270_v37 }
 0x2d4   : > { %v794_v41 = vpop.f32.mrf.mxu0 }
 0x2d5   : > { %v1793_v42 = vadd.f32 %v1193_v38, %v880_v39  ;;  %v872_v43 = vadd.f32 %v871_v34, %v794_v41 }
 0x2d6   : > { %v1271_v44 = vpop.f32.mrf.mxu0 }
 0x2d7   : > { %v919_v45 = vsub.f32 0.0, %v1793_v42  ;;  %v1796_v46 = vadd.f32 %v1193_v38, %v872_v43  ;;  %v883_v47 = vadd.f32 %v1283_v35, %v1271_v44 }
 0x2d8   : > { %v797_v49 = vpop.f32.mrf.mxu0 }
 0x2d9   : > { %v929_v50 = vmul.f32 1.442695, %v919_v45  ;;  %v917_v51 = vsub.f32 0.0, %v1796_v46  ;;  %v1799_v52 = vadd.f32 %v1193_v38, %v883_v47  ;;  %v875_v53 = vadd.f32 %v874_v36, %v797_v49 }
 0x2da   : > { %v1274_v54 = vpop.f32.mrf.mxu0 }
 0x2db   : > { %v925_v55 = vmul.f32 1.442695, %v917_v51  ;;  %v920_v56 = vsub.f32 0.0, %v1799_v52  ;;  %v910_v57 = vadd.f32 %v1193_v38, %v875_v53  ;;  %1440 = vpow2.f32 %v929_v50 }
 0x2dc   : > { %v896_v59 = vadd.f32 %v1286_v40, %v1274_v54  ;;  %v810_v60 = vpop.f32.mrf.mxu0 }
 0x2dd   : > { %1442 = vpow2.f32 %v925_v55  ;;  %v931_v61 = vmul.f32 1.442695, %v920_v56  ;;  %v918_v62 = vsub.f32 0.0, %v910_v57  ;;  %v888_v63 = vadd.f32 %v887_v48, %v810_v60 }
 0x2de   : > { %v1802_v0 = vadd.f32 %v1193_v38, %v896_v59  ;;  %v1275_v1 = vpop.f32.mrf.mxu0 }
 0x2df   : > { %1444 = vpow2.f32 %v931_v61  ;;  %v927_v2 = vmul.f32 1.442695, %v918_v62  ;;  %v913_v3 = vadd.f32 %v1193_v38, %v888_v63  ;;  %v899_v4 = vadd.f32 %v1287_v58, %v1275_v1  ;;  %v1007_v62 = vld [vmem:[#allocation2] sm:$0x1] }
 0x2e0   : > { %v923_v6 = vsub.f32 0.0, %v1802_v0  ;;  %v813_v7 = vpop.f32.mrf.mxu0 }
 0x2e1   : > { %1446 = vpow2.f32 %v927_v2  ;;  %v921_v8 = vsub.f32 0.0, %v913_v3  ;;  %v916_v9 = vadd.f32 %v1193_v38, %v899_v4  ;;  %v891_v10 = vadd.f32 %v890_v5, %v813_v7 }
 0x2e2   : > { %v937_v11 = vmul.f32 1.442695, %v923_v6 }
 0x2e3   : > { %v933_v13 = vmul.f32 1.442695, %v921_v8  ;;  %v924_v14 = vsub.f32 0.0, %v916_v9  ;;  %v914_v16 = vadd.f32 %v1193_v38, %v891_v10 }
 0x2e4   : > { %1448 = vpow2.f32 %v937_v11 }
 0x2e5   : > { %1450 = vpow2.f32 %v933_v13  ;;  %v939_v17 = vmul.f32 1.442695, %v924_v14  ;;  %v922_v15 = vsub.f32 0.0, %v914_v16 }
 0x2e7   : > { %1452 = vpow2.f32 %v939_v17  ;;  %v935_v18 = vmul.f32 1.442695, %v922_v15 }
 0x2e8   : > { %v1441_v19 = vpop.eup %1440 }
 0x2e9   : > { %1454 = vpow2.f32 %v935_v18  ;;  %v943_v22 = vadd.f32 1.0, %v1441_v19 }
 0x2ea   : > { %v1443_v12 = vpop.eup %1442 }
 0x2eb   : > { %v941_v20 = vadd.f32 1.0, %v1443_v12 }
 0x2ec   : > { %v1445_v21 = vpop.eup %1444 }
 0x2ed   : > { %1456 = vrcp.f32 %v941_v20  ;;  %v944_v24 = vadd.f32 1.0, %v1445_v21 }
 0x2ee   : > { %v1447_v23 = vpop.eup %1446  ;;  %1458 = vrcp.f32 %v943_v22 }
 0x2ef   : > { %v942_v25 = vadd.f32 1.0, %v1447_v23 }
 0x2f1   : > { %v1449_v26 = vpop.eup %1448  ;;  %1460 = vrcp.f32 %v942_v25 }
 0x2f2   : > { %v1451_v27 = vpop.eup %1450  ;;  %1462 = vrcp.f32 %v944_v24  ;;  %v947_v31 = vadd.f32 1.0, %v1449_v26 }
 0x2f3   : > { %v945_v28 = vadd.f32 1.0, %v1451_v27 }
 0x2f4   : > { %v1453_v30 = vpop.eup %1452 }
 0x2f5   : > { %1464 = vrcp.f32 %v945_v28  ;;  %v948_v32 = vadd.f32 1.0, %v1453_v30 }
 0x2f6   : > { %v1455_v33 = vpop.eup %1454  ;;  %1466 = vrcp.f32 %v947_v31 }
 0x2f7   : > { %v946_v29 = vadd.f32 1.0, %v1455_v33 }
 0x2f9   : > { %1468 = vrcp.f32 %v946_v29 }
 0x2fa   : > { %1470 = vrcp.f32 %v948_v32  ;;  %v1457_v34 = vpop.eup %1456 }
 0x2fb   : > { %v1459_v35 = vpop.eup %1458  ;;  %v957_v37 = vmul.f32 %v1457_v34, %v1796_v46 }
 0x2fc   : > { %v959_v40 = vmul.f32 %v1459_v35, %v1793_v42 }
 0x2fe   : > { %v1461_v36 = vpop.eup %1460 }
 0x2ff   : > { %v958_v38 = vmul.f32 %v1461_v36, %v910_v57  ;;  %v1463_v39 = vpop.eup %1462 }
 0x300   : > { %v960_v44 = vmul.f32 %v1463_v39, %v1799_v52 }
 0x301   : > { %v1040_v41 = vadd.f32 %v958_v38, %v957_v37 }
 0x302   : > { %v1465_v43 = vpop.eup %1464 }
 0x303   : > { %v1041_v45 = vadd.f32 %v1040_v41, %v959_v40  ;;  %v1467_v47 = vpop.eup %1466  ;;  %v961_v48 = vmul.f32 %v1465_v43, %v913_v3 }
 0x304   : > { %v963_v46 = vmul.f32 %v1467_v47, %v1802_v0 }
 0x305   : > { %v1042_v49 = vadd.f32 %v1041_v45, %v960_v44 }
 0x306   : > { %v1469_v50 = vpop.eup %1468 }
 0x307   : > { %v1043_v51 = vadd.f32 %v1042_v49, %v961_v48  ;;  %v962_v53 = vmul.f32 %v1469_v50, %v914_v16  ;;  %v1471_v54 = vpop.eup %1470 }
 0x308   : > { %v964_v56 = vmul.f32 %v1471_v54, %v916_v9 }
 0x309   : > { %v1044_v55 = vadd.f32 %v1043_v51, %v962_v53 }
 0x30b   : > { %v1045_v57 = vadd.f32 %v1044_v55, %v963_v46 }
 0x30d   : > { %v1046_v42 = vadd.f32 %v1045_v57, %v964_v56 }
 0x30f   : > { %v1047_v58 = vrot.slane %v1046_v42, 4 }
 0x311   : > { %v1048_v59 = vadd.f32 %v1047_v58, %v1046_v42 }
 0x313   : > { %v1049_v60 = vrot.slane %v1048_v59, 2 }
 0x315   : > { %v1050_v52 = vadd.f32 %v1049_v60, %v1048_v59 }
 0x317   : > { %v1051_v61 = vrot.slane %v1050_v52, 1 }
 0x319   : > { %v1052_v63 = vadd.f32 %v1051_v61, %v1050_v52 }
 0x31b   : > { %v1053_v1 = vadd.f32 %v1052_v63, %v1007_v62 }
 0x31d   : > { %1054 = vst [vmem:[#allocation2] sm:$0x1] %v1053_v1 }
 0x324   : > { %v1055_v2 = vld [vmem:[#allocation2] sm:$0x1] }
 0x325   : > { %v1056_v0 = vmul.f32 0.015625, %v1055_v2 }
 0x327   : > { %1057 = vst [vmem:[%s335_s14] sm:$0x1] %v1056_v0 }
 0x328   : > { %1511 = shalt.err (!%p1508_p3)
}
 0x329   : > { %s1512_s26 = scalar_lea.hbm %s1069_s22, 16  ;;  %s1516_s14 = scalar_lea.hbm %s1856_s8, 32 }
 0x32a   : > { %p1513_p5 = scmp.ne.s32.totalorder %s1069_s22, %s1512_s26  ;;  %p1517_p9 = scmp.lt.s32.totalorder %s1069_s22, %s1856_s8 }
 0x32b   : > { %p1518_p12 = scmp.lt.s32.totalorder %s1516_s14, %s1512_s26 }
 0x32c   : > { %p1514_p6 = pnand %p1513_p5, %p1671_p4 }
 0x32d   : > { %p1519_p10 = por %p1518_p12, %p1517_p9 }
 0x32e   : > { %p1515_p7 = pneg %p1514_p6 }
 0x330   : > { %p1520_p11 = pnand %p1519_p10, %p1515_p7 }
 0x332   : > { %1523 = shalt.err (!%p1520_p11)
}
 0x333   : > { %1292 = dma.vmem_to_hbm [thread:$0]  (%p1671_p4), %s1072_s16, 16, %s1069_s22, %s1059_s23  }
 0x334 PF: > { %p1304_p13 = scmp.ge.s32.totalorder %s1578_s10, 2  ;;  %s1083_s20 = sand.u32 1, %s1558_s27  }
 0x335   : > { %s1084_s24 = scalar_lea.sflag [#allocation5], %s1083_s20 }
 0x336   : > { %p1299_p0 = pnand %p1304_p13, %p1678_p8 }
 0x338   : > { %p1300_p1 = pneg %p1299_p0 }
 0x33a   : > { %1553 = dma.done.wait (%p1300_p1), %s1084_s24, 16  }
 0x33b   : > { %1555 = vsyncadd (%p1300_p1), %s1084_s24, 4294967280  ;;  %s22_s10 = sadd.s32 1, %s1578_s10   ;;  %s1861_s27 = smov %s1562_s28 }
 0x33c   : > { %p19_p2 = scmp.ge.s32.totalorder %s22_s10, 4   ;;  %s1862_s28 = smov %s1566_s29 }
 0x33d   : > { %s1863_s29 = smov %s1684_s18  ;;  %s1864_s30 = smov %s1574_s9 }
 0x33e   : > { %s1865_s9 = smov %s1867_s13  ;;  %21 = sbr.rel (!%p19_p2) target bundleno = 5 (0x5), region = 104 }
 0x343   :  { %1088 = vsyncpa [#allocation4], 1 }
 0x344   :  { %1090 = vsyncpa [#allocation4 + $0x1], 1 }
 0x345   :  { %1091 = vsyncpa [#allocation5], 1 }
 0x346   :  { %1093 = vsyncpa [#allocation5 + $0x1], 1 }

</bundles_post_ra>
